<compile_context>
chip_gen: v7x
topology: tpu7x:2x2x1
jax: 0.10.0
libtpu: 0.0.40
codegen_flags: <defaults>
</compile_context>

<pallas_src>
import numpy as np

import jax
import jax.numpy as jnp
from jax.experimental import pallas as pl
from jax.experimental.pallas import tpu as pltpu


# ---------------------------------------------------------------------------
# pltpu.roll sign-convention probe (runs one tiny kernel once, cached).
# Guarantees the im2col shifts are correct regardless of the rotate direction.
# ---------------------------------------------------------------------------
_ROLL_IS_NP = None


def _roll_is_np_convention():
    """True iff pltpu.roll(x, s, axis) == np.roll(x, s, axis)  (result[i] = x[i - s])."""
    global _ROLL_IS_NP
    if _ROLL_IS_NP is None:
        def probe(x_ref, o_ref):
            o_ref[...] = pltpu.roll(x_ref[...], 1, 1)

        x = jnp.broadcast_to(jnp.arange(128, dtype=jnp.float32), (8, 128))
        out = pl.pallas_call(
            probe, out_shape=jax.ShapeDtypeStruct((8, 128), jnp.float32))(x)
        _ROLL_IS_NP = bool(jax.device_get(out)[0, 0] == 127.0)
    return _ROLL_IS_NP


# ---------------------------------------------------------------------------
# fused stage kernel: GroupNorm -> SiLU -> im2col -> one big conv matmul (+skip)
# ---------------------------------------------------------------------------
def _make_stage_kernel(*, groups, C_in, C_out, H, W, Wp, Lp, skip_mode, roll_np,
                       eps=1e-5):
    """Everything operates on the padded, flattened layout:
       index m = (y+1)*Wp + (x+1) holds pixel (y, x); halo rows/cols and the tail
       [ (H+2)*Wp, Lp ) are exactly zero on input and are re-zeroed on output."""
    inv_count = 1.0 / float((C_in // groups) * H * W)

    # tap t = dy*3+dx reads input at flattened offset d = dy*Wp + dx - (Wp+1)
    shifts = []
    for dy in range(3):
        for dx in range(3):
            d = dy * Wp + dx - (Wp + 1)
            shifts.append(((-d) % Lp) if roll_np else (d % Lp))

    def _norm_silu_im2col(x_ref, memT_ref, mask_ref, g_ref, be_ref, col_scr):
        x = x_ref[...].astype(jnp.float32)            # (C_in, Lp); halo/tail are zero
        mask = mask_ref[...]                          # (1, Lp)
        memT = memT_ref[...]                          # (C_in, G) 0/1 membership
        # --- GroupNorm statistics, two-pass (centered) in f32 ---------------
        s = jnp.sum(x, axis=1, keepdims=True)                                  # (C_in,1)
        gsum = jax.lax.dot_general(memT, s, (((0,), (0,)), ((), ())),
                                   preferred_element_type=jnp.float32)         # (G,1)
        mean_c = jnp.dot(memT, gsum * inv_count,
                         preferred_element_type=jnp.float32)                   # (C_in,1)
        d = (x - mean_c) * mask                       # centered, halo re-zeroed
        ss = jnp.sum(d * d, axis=1, keepdims=True)
        gss = jax.lax.dot_general(memT, ss, (((0,), (0,)), ((), ())),
                                  preferred_element_type=jnp.float32)
        rstd_c = jnp.dot(memT, jax.lax.rsqrt(gss * inv_count + eps),
                         preferred_element_type=jnp.float32)                   # (C_in,1)
        # --- folded affine + SiLU -------------------------------------------
        y = d * (rstd_c * g_ref[...]) + be_ref[...]
        h = y * jax.nn.sigmoid(y) * mask              # SiLU (EUP sigmoid), halo re-zeroed
        # --- im2col in bf16: row block t holds h shifted for conv tap t ------
        for t, sh in enumerate(shifts):
            rolled = h if sh == 0 else pltpu.roll(h, sh, 1)   # XLU lane rotate
            col_scr[t * C_in:(t + 1) * C_in, :] = rolled.astype(col_scr.dtype)
        return mask

    def _conv(w_ref, b_ref, col_scr):
        # single K = 9*C_in bf16 matmul, f32 accumulation
        acc = jnp.dot(w_ref[...], col_scr[...], preferred_element_type=jnp.float32)
        return acc + b_ref[...]                       # (C_out, Lp)

    if skip_mode == "none":
        def kernel(x_ref, memT_ref, mask_ref, g_ref, be_ref, w_ref, b_ref,
                   o_ref, col_scr):
            mask = _norm_silu_im2col(x_ref, memT_ref, mask_ref, g_ref, be_ref, col_scr)
            o_ref[...] = (_conv(w_ref, b_ref, col_scr) * mask).astype(o_ref.dtype)

    elif skip_mode == "identity":
        def kernel(x_ref, memT_ref, mask_ref, g_ref, be_ref, w_ref, b_ref,
                   res_ref, o_ref, col_scr):
            mask = _norm_silu_im2col(x_ref, memT_ref, mask_ref, g_ref, be_ref, col_scr)
            acc = _conv(w_ref, b_ref, col_scr) * mask
            acc = acc + res_ref[...].astype(jnp.float32)      # residual halo is zero
            o_ref[...] = acc.astype(o_ref.dtype)

    else:  # "conv1x1": fused 1x1-conv skip on the original input + residual add
        def kernel(x_ref, memT_ref, mask_ref, g_ref, be_ref, w_ref, b_ref,
                   xo_ref, sw_ref, sb_ref, o_ref, col_scr):
            mask = _norm_silu_im2col(x_ref, memT_ref, mask_ref, g_ref, be_ref, col_scr)
            acc = _conv(w_ref, b_ref, col_scr)
            acc = acc + jnp.dot(sw_ref[...], xo_ref[...].astype(jnp.float32),
                                preferred_element_type=jnp.float32) + sb_ref[...]
            o_ref[...] = (acc * mask).astype(o_ref.dtype)

    return kernel


def _fused_stage(x_flat, gn_w, gn_b, conv_w, conv_b, *, groups, H, W, Wp, Lp,
                 roll_np, res_flat=None, skip_x_flat=None, skip_w=None, skip_b=None):
    """One fused stage on the padded flattened layout (N, C, Lp) -> (N, C_out, Lp)."""
    N, C, _ = x_flat.shape
    C_out = conv_w.shape[0]
    assert C % groups == 0 and C % 8 == 0

    # group-membership matrix (C, G): channel c belongs to group c // (C // groups)
    memT = jnp.asarray((np.arange(C)[:, None] // (C // groups)
                        == np.arange(groups)[None, :]).astype(np.float32))

    # validity mask over the padded, flattened layout
    mask_np = np.zeros((H + 2, Wp), np.float32)
    mask_np[1:H + 1, 1:W + 1] = 1.0
    mask_full = np.zeros((Lp,), np.float32)
    mask_full[:(H + 2) * Wp] = mask_np.reshape(-1)
    mask = jnp.asarray(mask_full.reshape(1, Lp))

    gamma = gn_w.reshape(C, 1).astype(jnp.float32)
    beta = gn_b.reshape(C, 1).astype(jnp.float32)
    # conv weight laid out to match the im2col row order: column = (dy*3+dx)*C + c
    w_big = jnp.transpose(conv_w, (0, 2, 3, 1)).reshape(C_out, 9 * C).astype(jnp.bfloat16)
    bias = conv_b.reshape(C_out, 1).astype(jnp.float32)

    inputs = [x_flat, memT, mask, gamma, beta, w_big, bias]
    in_specs = [
        pl.BlockSpec((pl.Squeezed(), C, Lp), lambda n: (n, 0, 0)),
        pl.BlockSpec((C, groups), lambda n: (0, 0)),
        pl.BlockSpec((1, Lp), lambda n: (0, 0)),
        pl.BlockSpec((C, 1), lambda n: (0, 0)),
        pl.BlockSpec((C, 1), lambda n: (0, 0)),
        pl.BlockSpec((C_out, 9 * C), lambda n: (0, 0)),
        pl.BlockSpec((C_out, 1), lambda n: (0, 0)),
    ]

    if res_flat is not None:                          # identity skip (C_out == C_in)
        skip_mode = "identity"
        inputs.append(res_flat)
        in_specs.append(pl.BlockSpec((pl.Squeezed(), C_out, Lp), lambda n: (n, 0, 0)))
    elif skip_w is not None:                          # 1x1-conv skip, fused
        skip_mode = "conv1x1"
        C_skip = skip_x_flat.shape[1]
        inputs += [skip_x_flat, skip_w.astype(jnp.float32),
                   skip_b.reshape(C_out, 1).astype(jnp.float32)]
        in_specs += [
            pl.BlockSpec((pl.Squeezed(), C_skip, Lp), lambda n: (n, 0, 0)),
            pl.BlockSpec((C_out, C_skip), lambda n: (0, 0)),
            pl.BlockSpec((C_out, 1), lambda n: (0, 0)),
        ]
    else:
        skip_mode = "none"

    kernel = _make_stage_kernel(groups=groups, C_in=C, C_out=C_out, H=H, W=W,
                                Wp=Wp, Lp=Lp, skip_mode=skip_mode, roll_np=roll_np)

    out_dtype = x_flat.dtype
    # explicit scoped-VMEM budget (v5e default 16 MiB, v6e/v7x 32 MiB; v7x physical 64 MiB)
    per_step = 2 * C * Lp * x_flat.dtype.itemsize          # x block, double-buffered
    per_step += 2 * C_out * Lp * jnp.dtype(out_dtype).itemsize
    if res_flat is not None:
        per_step += 2 * C_out * Lp * res_flat.dtype.itemsize
    if skip_x_flat is not None:
        per_step += 2 * skip_x_flat.shape[1] * Lp * skip_x_flat.dtype.itemsize
    per_step += 9 * C * Lp * 2                              # bf16 im2col scratch
    per_step += 2 * C_out * 9 * C * 2                       # bf16 weights
    per_step += 4 * C * Lp * 4                              # f32 temporaries headroom
    vmem_limit = int(min(64 * 1024 * 1024, max(16 * 1024 * 1024, 2 * per_step)))

    out_flat = pl.pallas_call(
        kernel,
        out_shape=jax.ShapeDtypeStruct((N, C_out, Lp), out_dtype),
        grid=(N,),
        in_specs=in_specs,
        out_specs=pl.BlockSpec((pl.Squeezed(), C_out, Lp), lambda n: (n, 0, 0)),
        scratch_shapes=[pltpu.VMEM((9 * C, Lp), jnp.bfloat16)],
        compiler_params=pltpu.CompilerParams(
            dimension_semantics=("parallel",),
            vmem_limit_bytes=vmem_limit),
    )(*inputs)
    return out_flat


# ---------------------------------------------------------------------------
# ResBlock forward
# ---------------------------------------------------------------------------
def _resblock_impl(x, p, groups, roll_np):
    N, C, H, W = x.shape
    C_out = p["conv1_w"].shape[0]
    Wp = W + 2                                   # minimal row padding (1 left / 1 right)
    Hp = H + 2                                   # 1 top / 1 bottom halo row
    L = Hp * Wp
    Lp = ((L + 127) // 128) * 128                # lane-dense flattened length

    # one-time pad into the padded, flattened layout; halo + tail are exact zeros
    x_pad = jnp.pad(x, ((0, 0), (0, 0), (1, 1), (1, 1))).reshape(N, C, L)
    x_flat = jnp.pad(x_pad, ((0, 0), (0, 0), (0, Lp - L))) if Lp > L else x_pad

    # in_layers: GN + SiLU + conv3x3  (output stays in the padded flattened layout)
    h1 = _fused_stage(x_flat, p["gn1_w"], p["gn1_b"], p["conv1_w"], p["conv1_b"],
                      groups=groups, H=H, W=W, Wp=Wp, Lp=Lp, roll_np=roll_np)

    # out_layers: GN + SiLU + (dropout: identity in eval) + conv3x3, skip fused in
    if C_out == C:
        out_flat = _fused_stage(h1, p["gn2_w"], p["gn2_b"], p["conv2_w"], p["conv2_b"],
                                groups=groups, H=H, W=W, Wp=Wp, Lp=Lp, roll_np=roll_np,
                                res_flat=x_flat)
    else:
        out_flat = _fused_stage(h1, p["gn2_w"], p["gn2_b"], p["conv2_w"], p["conv2_b"],
                                groups=groups, H=H, W=W, Wp=Wp, Lp=Lp, roll_np=roll_np,
                                skip_x_flat=x_flat, skip_w=p["skip_w"], skip_b=p["skip_b"])

    # single final slice back to (N, C_out, H, W)
    return out_flat[:, :, :L].reshape(N, C_out, Hp, Wp)[:, :, 1:H + 1, 1:W + 1]


_resblock_jit = jax.jit(_resblock_impl, static_argnums=(2, 3))


def resblock_forward(x, p, groups=32):
    """Pallas ResBlock forward (default config: no up/down, eval-mode dropout)."""
    return _resblock_jit(x, p, groups, _roll_is_np_convention())


# ---------------------------------------------------------------------------
# pure-JAX reference (mirrors the PyTorch module)
# ---------------------------------------------------------------------------
def _ref_gn_silu(x, gamma, beta, groups, eps=1e-5):
    N, C, H, W = x.shape
    xg = x.reshape(N, groups, (C // groups) * H * W)
    mean = xg.mean(axis=-1, keepdims=True)
    var = xg.var(axis=-1, keepdims=True)
    xn = ((xg - mean) / jnp.sqrt(var + eps)).reshape(N, C, H, W)
    y = xn * gamma[None, :, None, None] + beta[None, :, None, None]
    return y * jax.nn.sigmoid(y)


def _ref_conv3x3(x, w, b):
    y = jax.lax.conv_general_dilated(x, w, (1, 1), ((1, 1), (1, 1)),
                                     dimension_numbers=("NCHW", "OIHW", "NCHW"))
    return y + b[None, :, None, None]


def _ref_resblock(x, p, groups):
    h = _ref_conv3x3(_ref_gn_silu(x, p["gn1_w"], p["gn1_b"], groups),
                     p["conv1_w"], p["conv1_b"])
    h = _ref_conv3x3(_ref_gn_silu(h, p["gn2_w"], p["gn2_b"], groups),
                     p["conv2_w"], p["conv2_b"])
    if "skip_w" in p:
        skip = jnp.einsum("oi,nihw->nohw", p["skip_w"], x) \
            + p["skip_b"][None, :, None, None]
    else:
        skip = x
    return skip + h


def _check(out, ref, max_abs_tol, rel_tol):
    rel = float(jnp.linalg.norm(out - ref) / jnp.linalg.norm(ref))
    mx = float(jnp.max(jnp.abs(out - ref)))
    assert rel < rel_tol and mx < max_abs_tol, (rel, mx)


# ---------------------------------------------------------------------------
if __name__ == "__main__":
    G = 32
    N, C, C_out, H, W = 2, 32, 64, 16, 16

    key = jax.random.PRNGKey(0)
    ks = jax.random.split(key, 16)
    x = jax.random.normal(ks[0], (N, C, H, W), jnp.float32)

    # --- config 1: out_channels != channels  -> fused 1x1-conv skip -------------
    p = {
        "gn1_w": 1.0 + 0.1 * jax.random.normal(ks[1], (C,), jnp.float32),
        "gn1_b": 0.1 * jax.random.normal(ks[2], (C,), jnp.float32),
        "conv1_w": 0.1 * jax.random.normal(ks[3], (C_out, C, 3, 3), jnp.float32),
        "conv1_b": 0.1 * jax.random.normal(ks[4], (C_out,), jnp.float32),
        "gn2_w": 1.0 + 0.1 * jax.random.normal(ks[5], (C_out,), jnp.float32),
        "gn2_b": 0.1 * jax.random.normal(ks[6], (C_out,), jnp.float32),
        # zero_module() zeroes this conv at init; random weights are a stricter test
        "conv2_w": 0.1 * jax.random.normal(ks[7], (C_out, C_out, 3, 3), jnp.float32),
        "conv2_b": 0.1 * jax.random.normal(ks[8], (C_out,), jnp.float32),
        "skip_w": 0.1 * jax.random.normal(ks[9], (C_out, C), jnp.float32),
        "skip_b": 0.1 * jax.random.normal(ks[10], (C_out,), jnp.float32),
    }
    out = jax.block_until_ready(resblock_forward(x, p, groups=G))
    ref = _ref_resblock(x, p, G)
    assert out.shape == (N, C_out, H, W)
    # bf16 MXU operands (f32 accumulation) -> looser elementwise tolerance than pure f32
    _check(out, ref, max_abs_tol=5e-2, rel_tol=5e-3)

    # --- config 2: out_channels == channels  -> identity skip -------------------
    p2 = {
        "gn1_w": 1.0 + 0.1 * jax.random.normal(ks[11], (C,), jnp.float32),
        "gn1_b": 0.1 * jax.random.normal(ks[12], (C,), jnp.float32),
        "conv1_w": 0.1 * jax.random.normal(ks[13], (C, C, 3, 3), jnp.float32),
        "conv1_b": 0.1 * jax.random.normal(ks[14], (C,), jnp.float32),
        "gn2_w": jnp.ones((C,), jnp.float32),
        "gn2_b": jnp.zeros((C,), jnp.float32),
        "conv2_w": 0.1 * jax.random.normal(ks[15], (C, C, 3, 3), jnp.float32),
        "conv2_b": jnp.zeros((C,), jnp.float32),
    }
    out2 = jax.block_until_ready(resblock_forward(x, p2, groups=G))
    ref2 = _ref_resblock(x, p2, G)
    assert out2.shape == (N, C, H, W)
    _check(out2, ref2, max_abs_tol=5e-2, rel_tol=5e-3)

    print("KERNEL_OK")
</pallas_src>

<mosaic_0001>
module attributes {stable_mosaic.version = 11 : i64} {
  func.func @probe(%arg0: memref<8x128xf32, #tpu.memory_space<vmem>>, %arg1: memref<8x128xf32, #tpu.memory_space<vmem>>) attributes {dimension_semantics = [], scalar_prefetch = 0 : i64, scratch_operands = 0 : i64, tpu.core_type = #tpu.core_type<tc>} {
    %c0 = arith.constant 0 : index
    %c0_0 = arith.constant 0 : index
    %0 = vector.load %arg0[%c0, %c0_0] : memref<8x128xf32, #tpu.memory_space<vmem>>, vector<8x128xf32>
    %c1_i32 = arith.constant 1 : i32
    %1 = tpu.dynamic_rotate %0 by %c1_i32 dim 1 : vector<8x128xf32>, i32 -> vector<8x128xf32>
    %c0_1 = arith.constant 0 : index
    %c0_2 = arith.constant 0 : index
    %2 = vector.load %arg1[%c0_1, %c0_2] : memref<8x128xf32, #tpu.memory_space<vmem>>, vector<8x128xf32>
    tpu.vector_store %arg1[%c0_1, %c0_2], %1 {strides = array<i32>} : memref<8x128xf32, #tpu.memory_space<vmem>>, vector<8x128xf32>,
    return
  }
}

</mosaic_0001>

<bundles_post_ra>
// kernel: tpu_custom_call.1
= control target key start
LH: loop header
LB: loop body
LE: loop exit
PB: predicated region body
PF: predicated region fallthrough
CT: control target
= control target key end

     0   :  { %6 = vsyncpa [#allocation3], 0  ;;  %s128_s0 = inlined_call_operand.hbm [shape: f32[8,128], index: 0, kind: input, shape index: {}]   ;;  %s129_s1 = inlined_call_operand.hbm [shape: f32[8,128], index: 1, kind: output, shape index: {}]  }
   0x1   :  { %7 = vsyncpa [#allocation4], 0  ;;  %s91_s6 = smov [#allocation2]   ;;  %s43_s10 = scalar_lea.hbm %s128_s0, 128 }
   0x2   :  { %s14_s7 = sshll.u32 %s91_s6, 4  ;;  %p44_p0 = scmp.ne.s32.totalorder %s128_s0, %s43_s10  ;;  %s15_s7 = int_to_ptr.vmem [resolvable:$true] %s14_s7 }
   0x3   :  { %p47_p1 = scmp.lt.u32.totalorder %s43_s10, %s128_s0 }
   0x5   :  { %p49_p2 = pnand %p47_p1, %p44_p0 }
   0x7   :  { %52 = shalt.err (!%p49_p2)
}
   0x8   :  { %s53_s15 = scalar_lea.vmem %s15_s7, 128  ;;  %p58_p4 = scmp.lt.s32.totalorder %s15_s7, %s15_s7 }
   0x9   :  { %p54_p3 = scmp.ne.s32.totalorder %s15_s7, %s53_s15  ;;  %p59_p5 = scmp.lt.s32.totalorder %s53_s15, %s53_s15 }
   0xb   :  { %p60_p6 = por %p59_p5, %p58_p4 }
   0xd   :  { %p61_p7 = pnand %p60_p6, %p54_p3 }
   0xf   :  { %64 = shalt.err (!%p61_p7)
}
  0x10   :  { %17 = dma.hbm_to_vmem [thread:$0]  %s128_s0, 128, %s15_s7, [#allocation3]  }
  0x11   :  { %87 = dma.done.wait [#allocation3], 128  }
  0x12   :  { %88 = vsyncadd [#allocation3], 4294967168  ;;  %v21_v0 = vld [vmem:[#allocation2] sm:$0xff]  ;;  %s92_s18 = smov 1   ;;  %s93_s19 = smov [#allocation5]  }
  0x13   :  { %22 = vrot.lane.b32.xlu0 %v21_v0, %s92_s18  ;;  %s31_s20 = sshll.u32 %s93_s19, 4  ;;  %s32_s20 = int_to_ptr.vmem [resolvable:$true] %s31_s20 }
  0x14   :  { %s65_s21 = scalar_lea.vmem %s32_s20, 128  ;;  %p70_p9 = scmp.lt.s32.totalorder %s32_s20, %s32_s20 }
  0x15   :  { %p66_p8 = scmp.ne.s32.totalorder %s32_s20, %s65_s21  ;;  %p71_p10 = scmp.lt.s32.totalorder %s65_s21, %s65_s21 }
  0x17   :  { %p72_p11 = por %p71_p10, %p70_p9 }
  0x19   :  { %p73_p12 = pnand %p72_p11, %p66_p8 }
  0x85   :  { %v23_v1 = vpop.permute.xlu0 %22 }
  0x86   :  { %24 = vst [vmem:[#allocation5] sm:$0xff] %v23_v1 }
  0x87   :  { %76 = shalt.err (!%p73_p12)
}
  0x88   :  { %s77_s0 = scalar_lea.hbm %s129_s1, 128 }
  0x89   :  { %p78_p13 = scmp.ne.s32.totalorder %s129_s1, %s77_s0  ;;  %p81_p0 = scmp.lt.u32.totalorder %s77_s0, %s129_s1 }
  0x8b   :  { %p83_p1 = pnand %p81_p0, %p78_p13 }
  0x8d   :  { %86 = shalt.err (!%p83_p1)
}
  0x8e   :  { %34 = dma.vmem_to_hbm [thread:$0]  %s32_s20, 128, %s129_s1, [#allocation4]  }
  0x8f   :  { %89 = dma.done.wait [#allocation4], 128  }
  0x90   :  { %90 = vsyncadd [#allocation4], 4294967168 }
  0x91   :  { %38 = vsyncpa [#allocation3], 1 }
  0x92   :  { %39 = vsyncpa [#allocation4], 1 }

</bundles_post_ra>
